<compile_context>
chip_gen: v6e
topology: v6e:2x2x1
jax: 0.10.0
libtpu: 0.0.40
codegen_flags: <defaults>
</compile_context>

<pallas_src>
import functools

import jax
import jax.numpy as jnp
from jax.experimental import pallas as pl
from jax.experimental.pallas import tpu as pltpu

EPS = 1e-07
_LANE = 128


def _round_up(x, m):
    return (x + m - 1) // m * m


def _vmem_budget_bytes():
    """Per-kernel VMEM working-set budget, gated by generation."""
    cap = 64 * 1024 * 1024  # conservative fallback (v7x per-TC VMEM)
    try:
        info = pltpu.get_tpu_info()
        cap = int(getattr(info, "vmem_capacity_bytes", cap))
    except Exception:
        pass
    # v7x (64 MiB/TC) -> ~32 MiB budget; v5e/v6e (128 MiB) -> ~56 MiB budget.
    return max(16 * 1024 * 1024, min(cap // 2, 56 * 1024 * 1024))


def _pick_hw_tile(hw, C, *, logits_itemsize, label_itemsize,
                  labels_are_indices, budget):
    """Largest 128-multiple spatial tile such that
       (a) double-buffered staging + f32 temporaries fit in `budget` VMEM, and
       (b) HBM bytes per grid step stay <= ~4 MiB (per-step overhead is
           already well amortized at ~1 MiB/step)."""
    def padded_sublanes(c, itemsize):
        pack = max(1, 4 // max(1, itemsize))   # sub-32-bit dtypes pack sublanes
        return _round_up(c, 8 * pack)

    # VMEM bytes per lane of tile:
    per_lane = 2 * padded_sublanes(C, logits_itemsize) * logits_itemsize  # logits, 2 bufs
    if labels_are_indices:
        per_lane += 2 * 8 * 4                                             # (1,1,T) i32, pad to 8 sublanes
    else:
        per_lane += 2 * padded_sublanes(C, label_itemsize) * label_itemsize
    per_lane += 8 * _round_up(C, 8) * 4                                   # f32 temporaries allowance

    vmem_cap_t = max(_LANE, int(budget * 0.85) // per_lane // _LANE * _LANE)

    hbm_per_lane = C * logits_itemsize + (4 if labels_are_indices
                                          else C * label_itemsize)
    hbm_cap_t = max(_LANE, (4 * 1024 * 1024) // hbm_per_lane // _LANE * _LANE)

    return min(_round_up(hw, _LANE), vmem_cap_t, hbm_cap_t)


def _gdice_kernel(logits_ref, label_ref, out_ref,
                  inse_acc, sq_acc, lab2_acc, lab_acc, *,
                  num_channels, hw, hw_tile, labels_are_indices):
    C = num_channels
    t = pl.program_id(1)
    n_t = pl.num_programs(1)

    @pl.when(t == 0)
    def _():
        inse_acc[...] = jnp.zeros_like(inse_acc)
        sq_acc[...] = jnp.zeros_like(sq_acc)
        lab2_acc[...] = jnp.zeros_like(lab2_acc)
        lab_acc[...] = jnp.zeros_like(lab_acc)

    x = logits_ref[0].astype(jnp.float32)                       # (C, T)

    need_mask = (hw % hw_tile) != 0                             # trace-time
    if need_mask:
        col = jax.lax.broadcasted_iota(jnp.int32, (1, hw_tile), 1)
        valid = (t * hw_tile + col) < hw                        # (1, T)

    # Labels: either the float tensor (general, matches the module contract)
    # or int32 class indices expanded to one-hot in-kernel (halves HBM).
    if labels_are_indices:
        idx = label_ref[0]                                      # (1, T) int32
        ch = jax.lax.broadcasted_iota(jnp.int32, (C, hw_tile), 0)
        onehot = ch == idx
        if need_mask:
            onehot = jnp.logical_and(onehot, valid)
        lab = onehot.astype(jnp.float32)                        # (C, T)
    else:
        lab = label_ref[0].astype(jnp.float32)                  # (C, T)
        if need_mask:
            lab = jnp.where(valid, lab, 0.0)

    # Softmax over the channel axis (dim=1 of NCHW); exact per spatial column,
    # so it commutes with spatial tiling.  One divide per column, C multiplies.
    m = jnp.max(x, axis=0, keepdims=True)                       # (1, T)
    e = jnp.exp(x - m)
    inv_denom = 1.0 / jnp.sum(e, axis=0, keepdims=True)         # exact
    sp = e * inv_denom                                          # (C, T)
    if need_mask:
        sp = jnp.where(valid, sp, 0.0)

    # Per-channel spatial partial sums accumulated in tiny VMEM scratch
    # (separate reductions; no 4C-wide sublane concat/relayout temp).
    inse_acc[...] += jnp.sum(sp * lab, axis=1, keepdims=True)   # (C, 1)
    sq_acc[...] += jnp.sum(sp * sp, axis=1, keepdims=True)
    if labels_are_indices:
        # one-hot => lab * lab == lab, one accumulator row serves both
        lab_acc[...] += jnp.sum(lab, axis=1, keepdims=True)
    else:
        lab2_acc[...] += jnp.sum(lab * lab, axis=1, keepdims=True)
        lab_acc[...] += jnp.sum(lab, axis=1, keepdims=True)

    @pl.when(t == n_t - 1)
    def _():
        inse_s = inse_acc[...]
        sq_s = sq_acc[...]
        lab_s = lab_acc[...]
        lab2_s = lab_s if labels_are_indices else lab2_acc[...]
        w = 1.0 / (lab_s * lab_s + EPS)                         # (C, 1)
        dice_c = 2.0 * (w * inse_s) / (w * sq_s + w * lab2_s + EPS)
        dice_b = jnp.sum(dice_c)                                # sum over channels
        out_ref[...] = jnp.full((1, 1, _LANE), dice_b, dtype=jnp.float32)


def _run(logits3, label3, *, B, C, hw, labels_are_indices, hw_tile):
    budget = _vmem_budget_bytes()
    if hw_tile is None:
        hw_tile = _pick_hw_tile(
            hw, C,
            logits_itemsize=logits3.dtype.itemsize,
            label_itemsize=label3.dtype.itemsize,
            labels_are_indices=labels_are_indices,
            budget=budget)
    hw_tile = max(_LANE, _round_up(hw_tile, _LANE))
    n_t = pl.cdiv(hw, hw_tile)

    kernel = functools.partial(
        _gdice_kernel, num_channels=C, hw=hw, hw_tile=hw_tile,
        labels_are_indices=labels_are_indices)

    if labels_are_indices:
        label_spec = pl.BlockSpec((1, 1, hw_tile), lambda b, t: (b, 0, t))
    else:
        label_spec = pl.BlockSpec((1, C, hw_tile), lambda b, t: (b, 0, t))

    dice = pl.pallas_call(
        kernel,
        out_shape=jax.ShapeDtypeStruct((B, 1, _LANE), jnp.float32),
        grid_spec=pltpu.PrefetchScalarGridSpec(
            num_scalar_prefetch=0,
            grid=(B, n_t),
            in_specs=[
                pl.BlockSpec((1, C, hw_tile), lambda b, t: (b, 0, t)),
                label_spec,
            ],
            out_specs=pl.BlockSpec((1, 1, _LANE), lambda b, t: (b, 0, 0)),
            scratch_shapes=[pltpu.VMEM((C, 1), jnp.float32) for _ in range(4)],
        ),
        compiler_params=pltpu.CompilerParams(
            dimension_semantics=("parallel", "arbitrary"),
            vmem_limit_bytes=int(budget),
        ),
    )(logits3, label3)

    dice_per_batch = dice[:, 0, 0]                              # (B,)
    return 1.0 - jnp.mean(dice_per_batch) / jnp.float32(C)


def generalized_dice_loss(logits, label, *, hw_tile=None):
    """General path (matches the PyTorch module): logits, label are
    (B, C, H, W) float arrays (any float dtype; math is done in f32)."""
    B, C, H, W = logits.shape
    assert label.shape == logits.shape
    hw = H * W
    return _run(logits.reshape(B, C, hw), label.reshape(B, C, hw),
                B=B, C=C, hw=hw, labels_are_indices=False, hw_tile=hw_tile)


def generalized_dice_loss_onehot_indices(logits, class_idx, *, hw_tile=None):
    """Fast path when labels are one-hot: class_idx is (B, H, W) int.
    Numerically identical to the general path on one_hot(class_idx)."""
    B, C, H, W = logits.shape
    assert class_idx.shape == (B, H, W)
    hw = H * W
    idx3 = class_idx.reshape(B, 1, hw).astype(jnp.int32)
    return _run(logits.reshape(B, C, hw), idx3,
                B=B, C=C, hw=hw, labels_are_indices=True, hw_tile=hw_tile)


def _reference_loss(logits, label):
    C = logits.shape[1]
    sp = jax.nn.softmax(logits.astype(jnp.float32), axis=1)
    lab = label.astype(jnp.float32)
    w = 1.0 / (jnp.sum(lab, axis=(2, 3)) ** 2 + EPS)            # (B, C)
    inse = w * jnp.sum(sp * lab, axis=(2, 3))
    l = w * jnp.sum(sp * sp, axis=(2, 3))
    r = w * jnp.sum(lab * lab, axis=(2, 3))
    dice = jnp.sum(2.0 * inse / (l + r + EPS), axis=1)          # (B,)
    return 1.0 - jnp.mean(dice) / C


if __name__ == "__main__":
    B, C, H, W = 2, 4, 16, 16
    key = jax.random.PRNGKey(0)
    k1, k2 = jax.random.split(key)

    logits = jax.random.normal(k1, (B, C, H, W), dtype=jnp.float32)
    classes = jax.random.randint(k2, (B, H, W), 0, C)
    label = jax.nn.one_hot(classes, C, axis=1, dtype=jnp.float32)  # (B, C, H, W)

    ref = jax.block_until_ready(_reference_loss(logits, label))

    # 1) General float-label path, forced 2 spatial tiles (cross-tile accumulation).
    loss = jax.block_until_ready(generalized_dice_loss(logits, label, hw_tile=128))
    assert jnp.allclose(loss, ref, rtol=1e-5, atol=1e-5), ("general/tiled", loss, ref)

    # 2) General path with the auto, generation-aware tile.
    loss = jax.block_until_ready(generalized_dice_loss(logits, label))
    assert jnp.allclose(loss, ref, rtol=1e-5, atol=1e-5), ("general/auto", loss, ref)

    # 3) One-hot index fast path (roughly half the HBM traffic).
    loss = jax.block_until_ready(
        generalized_dice_loss_onehot_indices(logits, classes, hw_tile=128))
    assert jnp.allclose(loss, ref, rtol=1e-5, atol=1e-5), ("indices", loss, ref)

    # 4) bf16 logits accepted directly (kernel upcasts to f32 internally).
    logits_bf16 = logits.astype(jnp.bfloat16)
    ref_bf16 = jax.block_until_ready(_reference_loss(logits_bf16, label))
    loss = jax.block_until_ready(generalized_dice_loss(logits_bf16, label))
    assert jnp.allclose(loss, ref_bf16, rtol=1e-5, atol=1e-5), ("bf16", loss, ref_bf16)

    # 5) Remainder-mask path: H*W not a multiple of the 128-lane tile.
    H2, W2 = 13, 13
    k3, k4 = jax.random.split(k2)
    logits2 = jax.random.normal(k3, (B, C, H2, W2), dtype=jnp.float32)
    classes2 = jax.random.randint(k4, (B, H2, W2), 0, C)
    label2 = jax.nn.one_hot(classes2, C, axis=1, dtype=jnp.float32)
    ref2 = jax.block_until_ready(_reference_loss(logits2, label2))
    loss2 = jax.block_until_ready(generalized_dice_loss(logits2, label2, hw_tile=128))
    assert jnp.allclose(loss2, ref2, rtol=1e-5, atol=1e-5), ("masked", loss2, ref2)

    print("KERNEL_OK")
</pallas_src>

<mosaic_0001>
module attributes {stable_mosaic.version = 11 : i64} {
  func.func @_gdice_kernel(%arg0: i32, %arg1: i32, %arg2: memref<1x4x128xf32, #tpu.memory_space<vmem>>, %arg3: memref<1x4x128xf32, #tpu.memory_space<vmem>>, %arg4: memref<1x1x128xf32, #tpu.memory_space<vmem>>, %arg5: memref<4x1xf32, #tpu.memory_space<vmem>>, %arg6: memref<4x1xf32, #tpu.memory_space<vmem>>, %arg7: memref<4x1xf32, #tpu.memory_space<vmem>>, %arg8: memref<4x1xf32, #tpu.memory_space<vmem>>) attributes {dimension_semantics = [#tpu.dimension_semantics<parallel>, #tpu.dimension_semantics<arbitrary>], iteration_bounds = array<i64: 2, 2>, scalar_prefetch = 0 : i64, scratch_operands = 4 : i64, tpu.core_type = #tpu.core_type<tc>, window_params = [{transform_indices = @transform_0, window_bounds = array<i64: 1, 4, 128>}, {transform_indices = @transform_1, window_bounds = array<i64: 1, 4, 128>}, {transform_indices = @transform_2, window_bounds = array<i64: 1, 1, 128>}]} {
    %c0_i32 = arith.constant 0 : i32
    %0 = arith.cmpi eq, %arg1, %c0_i32 : i32
    %1 = arith.extui %0 : i1 to i32
    %c0_i32_0 = arith.constant 0 : i32
    %2 = arith.cmpi ne, %1, %c0_i32_0 : i32
    scf.if %2 {
      %cst_29 = arith.constant 0.000000e+00 : f32
      %44 = vector.broadcast %cst_29 : f32 to vector<4x1xf32>
      %c0_30 = arith.constant 0 : index
      %c0_31 = arith.constant 0 : index
      %45 = vector.load %arg5[%c0_30, %c0_31] : memref<4x1xf32, #tpu.memory_space<vmem>>, vector<4x1xf32>
      tpu.vector_store %arg5[%c0_30, %c0_31], %44 {strides = array<i32>} : memref<4x1xf32, #tpu.memory_space<vmem>>, vector<4x1xf32>,
      %cst_32 = arith.constant 0.000000e+00 : f32
      %46 = vector.broadcast %cst_32 : f32 to vector<4x1xf32>
      %c0_33 = arith.constant 0 : index
      %c0_34 = arith.constant 0 : index
      %47 = vector.load %arg6[%c0_33, %c0_34] : memref<4x1xf32, #tpu.memory_space<vmem>>, vector<4x1xf32>
      tpu.vector_store %arg6[%c0_33, %c0_34], %46 {strides = array<i32>} : memref<4x1xf32, #tpu.memory_space<vmem>>, vector<4x1xf32>,
      %cst_35 = arith.constant 0.000000e+00 : f32
      %48 = vector.broadcast %cst_35 : f32 to vector<4x1xf32>
      %c0_36 = arith.constant 0 : index
      %c0_37 = arith.constant 0 : index
      %49 = vector.load %arg7[%c0_36, %c0_37] : memref<4x1xf32, #tpu.memory_space<vmem>>, vector<4x1xf32>
      tpu.vector_store %arg7[%c0_36, %c0_37], %48 {strides = array<i32>} : memref<4x1xf32, #tpu.memory_space<vmem>>, vector<4x1xf32>,
      %cst_38 = arith.constant 0.000000e+00 : f32
      %50 = vector.broadcast %cst_38 : f32 to vector<4x1xf32>
      %c0_39 = arith.constant 0 : index
      %c0_40 = arith.constant 0 : index
      %51 = vector.load %arg8[%c0_39, %c0_40] : memref<4x1xf32, #tpu.memory_space<vmem>>, vector<4x1xf32>
      tpu.vector_store %arg8[%c0_39, %c0_40], %50 {strides = array<i32>} : memref<4x1xf32, #tpu.memory_space<vmem>>, vector<4x1xf32>,
    } else {
    }
    %c0 = arith.constant 0 : index
    %c0_1 = arith.constant 0 : index
    %c0_2 = arith.constant 0 : index
    %3 = vector.load %arg2[%c0, %c0_1, %c0_2] : memref<1x4x128xf32, #tpu.memory_space<vmem>>, vector<1x4x128xf32>
    %4 = vector.shape_cast %3 : vector<1x4x128xf32> to vector<4x128xf32>
    %c0_3 = arith.constant 0 : index
    %c0_4 = arith.constant 0 : index
    %c0_5 = arith.constant 0 : index
    %5 = vector.load %arg3[%c0_3, %c0_4, %c0_5] : memref<1x4x128xf32, #tpu.memory_space<vmem>>, vector<1x4x128xf32>
    %6 = vector.shape_cast %5 : vector<1x4x128xf32> to vector<4x128xf32>
    %cst = arith.constant dense<0xFF800000> : vector<128xf32>
    %7 = vector.multi_reduction <maximumf>, %4, %cst [0] : vector<4x128xf32> to vector<128xf32>
    %8 = vector.shape_cast %7 : vector<128xf32> to vector<1x128xf32>
    %9 = vector.broadcast %8 : vector<1x128xf32> to vector<4x128xf32>
    %10 = arith.subf %4, %9 : vector<4x128xf32>
    %11 = math.exp %10 : vector<4x128xf32>
    %cst_6 = arith.constant dense<0.000000e+00> : vector<128xf32>
    %12 = vector.multi_reduction <add>, %11, %cst_6 [0] : vector<4x128xf32> to vector<128xf32>
    %13 = vector.shape_cast %12 : vector<128xf32> to vector<1x128xf32>
    %cst_7 = arith.constant 1.000000e+00 : f32
    %14 = vector.broadcast %cst_7 : f32 to vector<1x128xf32>
    %15 = arith.divf %14, %13 : vector<1x128xf32>
    %16 = vector.broadcast %15 : vector<1x128xf32> to vector<4x128xf32>
    %17 = arith.mulf %11, %16 : vector<4x128xf32>
    %c0_8 = arith.constant 0 : index
    %c0_9 = arith.constant 0 : index
    %18 = vector.load %arg5[%c0_8, %c0_9] : memref<4x1xf32, #tpu.memory_space<vmem>>, vector<4x1xf32>
    %19 = arith.mulf %17, %6 : vector<4x128xf32>
    %cst_10 = arith.constant dense<0.000000e+00> : vector<4xf32>
    %20 = vector.multi_reduction <add>, %19, %cst_10 [1] : vector<4x128xf32> to vector<4xf32>
    %21 = vector.shape_cast %20 : vector<4xf32> to vector<4x1xf32>
    %22 = arith.addf %18, %21 : vector<4x1xf32>
    %c0_11 = arith.constant 0 : index
    %c0_12 = arith.constant 0 : index
    %23 = vector.load %arg5[%c0_11, %c0_12] : memref<4x1xf32, #tpu.memory_space<vmem>>, vector<4x1xf32>
    tpu.vector_store %arg5[%c0_11, %c0_12], %22 {strides = array<i32>} : memref<4x1xf32, #tpu.memory_space<vmem>>, vector<4x1xf32>,
    %c0_13 = arith.constant 0 : index
    %c0_14 = arith.constant 0 : index
    %24 = vector.load %arg6[%c0_13, %c0_14] : memref<4x1xf32, #tpu.memory_space<vmem>>, vector<4x1xf32>
    %25 = arith.mulf %17, %17 : vector<4x128xf32>
    %cst_15 = arith.constant dense<0.000000e+00> : vector<4xf32>
    %26 = vector.multi_reduction <add>, %25, %cst_15 [1] : vector<4x128xf32> to vector<4xf32>
    %27 = vector.shape_cast %26 : vector<4xf32> to vector<4x1xf32>
    %28 = arith.addf %24, %27 : vector<4x1xf32>
    %c0_16 = arith.constant 0 : index
    %c0_17 = arith.constant 0 : index
    %29 = vector.load %arg6[%c0_16, %c0_17] : memref<4x1xf32, #tpu.memory_space<vmem>>, vector<4x1xf32>
    tpu.vector_store %arg6[%c0_16, %c0_17], %28 {strides = array<i32>} : memref<4x1xf32, #tpu.memory_space<vmem>>, vector<4x1xf32>,
    %c0_18 = arith.constant 0 : index
    %c0_19 = arith.constant 0 : index
    %30 = vector.load %arg7[%c0_18, %c0_19] : memref<4x1xf32, #tpu.memory_space<vmem>>, vector<4x1xf32>
    %31 = arith.mulf %6, %6 : vector<4x128xf32>
    %cst_20 = arith.constant dense<0.000000e+00> : vector<4xf32>
    %32 = vector.multi_reduction <add>, %31, %cst_20 [1] : vector<4x128xf32> to vector<4xf32>
    %33 = vector.shape_cast %32 : vector<4xf32> to vector<4x1xf32>
    %34 = arith.addf %30, %33 : vector<4x1xf32>
    %c0_21 = arith.constant 0 : index
    %c0_22 = arith.constant 0 : index
    %35 = vector.load %arg7[%c0_21, %c0_22] : memref<4x1xf32, #tpu.memory_space<vmem>>, vector<4x1xf32>
    tpu.vector_store %arg7[%c0_21, %c0_22], %34 {strides = array<i32>} : memref<4x1xf32, #tpu.memory_space<vmem>>, vector<4x1xf32>,
    %c0_23 = arith.constant 0 : index
    %c0_24 = arith.constant 0 : index
    %36 = vector.load %arg8[%c0_23, %c0_24] : memref<4x1xf32, #tpu.memory_space<vmem>>, vector<4x1xf32>
    %cst_25 = arith.constant dense<0.000000e+00> : vector<4xf32>
    %37 = vector.multi_reduction <add>, %6, %cst_25 [1] : vector<4x128xf32> to vector<4xf32>
    %38 = vector.shape_cast %37 : vector<4xf32> to vector<4x1xf32>
    %39 = arith.addf %36, %38 : vector<4x1xf32>
    %c0_26 = arith.constant 0 : index
    %c0_27 = arith.constant 0 : index
    %40 = vector.load %arg8[%c0_26, %c0_27] : memref<4x1xf32, #tpu.memory_space<vmem>>, vector<4x1xf32>
    tpu.vector_store %arg8[%c0_26, %c0_27], %39 {strides = array<i32>} : memref<4x1xf32, #tpu.memory_space<vmem>>, vector<4x1xf32>,
    %c1_i32 = arith.constant 1 : i32
    %41 = arith.cmpi eq, %arg1, %c1_i32 : i32
    %42 = arith.extui %41 : i1 to i32
    %c0_i32_28 = arith.constant 0 : i32
    %43 = arith.cmpi ne, %42, %c0_i32_28 : i32
    scf.if %43 {
      %c0_29 = arith.constant 0 : index
      %c0_30 = arith.constant 0 : index
      %44 = vector.load %arg5[%c0_29, %c0_30] : memref<4x1xf32, #tpu.memory_space<vmem>>, vector<4x1xf32>
      %c0_31 = arith.constant 0 : index
      %c0_32 = arith.constant 0 : index
      %45 = vector.load %arg6[%c0_31, %c0_32] : memref<4x1xf32, #tpu.memory_space<vmem>>, vector<4x1xf32>
      %c0_33 = arith.constant 0 : index
      %c0_34 = arith.constant 0 : index
      %46 = vector.load %arg8[%c0_33, %c0_34] : memref<4x1xf32, #tpu.memory_space<vmem>>, vector<4x1xf32>
      %c0_35 = arith.constant 0 : index
      %c0_36 = arith.constant 0 : index
      %47 = vector.load %arg7[%c0_35, %c0_36] : memref<4x1xf32, #tpu.memory_space<vmem>>, vector<4x1xf32>
      %48 = arith.mulf %46, %46 : vector<4x1xf32>
      %cst_37 = arith.constant 1.000000e-07 : f32
      %49 = vector.broadcast %cst_37 : f32 to vector<4x1xf32>
      %50 = arith.addf %48, %49 : vector<4x1xf32>
      %cst_38 = arith.constant 1.000000e+00 : f32
      %51 = vector.broadcast %cst_38 : f32 to vector<4x1xf32>
      %52 = arith.divf %51, %50 : vector<4x1xf32>
      %53 = arith.mulf %52, %44 : vector<4x1xf32>
      %cst_39 = arith.constant 2.000000e+00 : f32
      %54 = vector.broadcast %cst_39 : f32 to vector<4x1xf32>
      %55 = arith.mulf %54, %53 : vector<4x1xf32>
      %56 = arith.mulf %52, %45 : vector<4x1xf32>
      %57 = arith.mulf %52, %47 : vector<4x1xf32>
      %58 = arith.addf %56, %57 : vector<4x1xf32>
      %cst_40 = arith.constant 1.000000e-07 : f32
      %59 = vector.broadcast %cst_40 : f32 to vector<4x1xf32>
      %60 = arith.addf %58, %59 : vector<4x1xf32>
      %61 = arith.divf %55, %60 : vector<4x1xf32>
      %62 = vector.shape_cast %61 : vector<4x1xf32> to vector<1x4x1xf32>
      %cst_41 = arith.constant dense<0.000000e+00> : vector<1xf32>
      %63 = vector.multi_reduction <add>, %62, %cst_41 [1, 2] : vector<1x4x1xf32> to vector<1xf32>
      %64 = vector.shape_cast %63 : vector<1xf32> to vector<1x1x1xf32>
      %65 = vector.extract %64[0, 0, 0] : f32 from vector<1x1x1xf32>
      %66 = vector.broadcast %65 : f32 to vector<1x1x128xf32>
      %c0_42 = arith.constant 0 : index
      %c0_43 = arith.constant 0 : index
      %c0_44 = arith.constant 0 : index
      %67 = vector.load %arg4[%c0_42, %c0_43, %c0_44] : memref<1x1x128xf32, #tpu.memory_space<vmem>>, vector<1x1x128xf32>
      tpu.vector_store %arg4[%c0_42, %c0_43, %c0_44], %66 {strides = array<i32>} : memref<1x1x128xf32, #tpu.memory_space<vmem>>, vector<1x1x128xf32>,
    } else {
    }
    return
  }
  func.func @transform_0(%arg0: i32, %arg1: i32) -> (i32, i32, i32) {
    %c0_i32 = arith.constant 0 : i32
    %c0_i32_0 = arith.constant 0 : i32
    return %arg0, %c0_i32, %arg1 : i32, i32, i32
  }
  func.func @transform_1(%arg0: i32, %arg1: i32) -> (i32, i32, i32) {
    %c0_i32 = arith.constant 0 : i32
    %c0_i32_0 = arith.constant 0 : i32
    return %arg0, %c0_i32, %arg1 : i32, i32, i32
  }
  func.func @transform_2(%arg0: i32, %arg1: i32) -> (i32, i32, i32) {
    %c0_i32 = arith.constant 0 : i32
    %c0_i32_0 = arith.constant 0 : i32
    %c0_i32_1 = arith.constant 0 : i32
    return %arg0, %c0_i32, %c0_i32_0 : i32, i32, i32
  }
}

</mosaic_0001>

<bundles_post_ra>
// kernel: tpu_custom_call.1
= control target key start
LH: loop header
LB: loop body
LE: loop exit
PB: predicated region body
PF: predicated region fallthrough
CT: control target
= control target key end

     0   :  { %s992_s0 = inlined_call_operand.hbm [shape: f32[2,4,256], index: 0, kind: input, shape index: {}]   ;;  %s993_s1 = inlined_call_operand.hbm [shape: f32[2,4,256], index: 1, kind: input, shape index: {}]   ;;  %s994_s2 = inlined_call_operand.hbm [shape: f32[2,1,128], index: 2, kind: output, shape index: {}]  }
   0x1   :  { %998 = sst [smem:[#allocation18_spill]] %s992_s0 }
   0x2   :  { %7 = vsyncpa [#allocation7], 0 }
   0x3   :  { %9 = vsyncpa [#allocation7 + $0x1], 0 }
   0x4   :  { %10 = vsyncpa [#allocation10], 0 }
   0x5   :  { %12 = vsyncpa [#allocation10 + $0x1], 0 }
   0x6   :  { %13 = vsyncpa [#allocation8], 0 }
   0x7   :  { %15 = vsyncpa [#allocation8 + $0x1], 0  ;;  %s761_s9 = smov 0   ;;  %s763_s10 = smov 0  }
   0x8   :  { %s765_s11 = smov 0   ;;  %s767_s12 = smov 0  }
   0x9   :  { %s769_s13 = smov 0   ;;  %s771_s14 = smov 0  }
   0xa   :  { %s773_s15 = smov 0   ;;  %s775_s16 = smov 0  }
   0xb   :  { %s777_s17 = smov 0   ;;  %s779_s18 = smov 0  }
   0xc   :  { %s781_s19 = smov 0  }
   0xd LB: > { %999 = sst [smem:[#allocation15_spill]] %s736_s18  ;;  %s424_s20 = sadd.s32 4294967295, %s740_s19   ;;  %s740_s19 = sphi %s781_s19, %s21_s19   ;;  %s736_s18 = sphi %s779_s18, %s1011_s18   ;;  %s732_s17 = sphi %s777_s17, %s1019_s17   ;;  %s728_s16 = sphi %s775_s16, %s1009_s16   ;;  %s724_s15 = sphi %s773_s15, %s1018_s15   ;;  %s720_s14 = sphi %s771_s14, %s1017_s14   ;;  %s716_s13 = sphi %s769_s13, %s1016_s13   ;;  %s712_s12 = sphi %s767_s12, %s1015_s12   ;;  %s708_s11 = sphi %s765_s11, %s1014_s11   ;;  %s704_s10 = sphi %s763_s10, %s1013_s10   ;;  %s700_s9 = sphi %s761_s9, %s1012_s9  }
   0xe   : > { %s425_s21 = sadd.s32 4294967294, %s740_s19   ;;  %s30_s22 = sadd.s32 1, %s732_s17 }
   0xf   : > { %s33_s23 = sadd.s32 1, %s736_s18  ;;  %p31_p0 = scmp.ge.s32.totalorder %s30_s22, 2 }
  0x10   : > { %s42_s24 = sadd.s32 1, %s720_s14  ;;  %p49_p1 = scmp.ne.s32.totalorder %s720_s14, %s716_s13 }
  0x11   : > { %p50_p2 = scmp.eq.s32.totalorder %s740_s19, 0  ;;  %s1021_s22 = smov (%p31_p0, %s30_s22), 0 }
  0x12   : > { %1000 = sst [smem:[#allocation16_spill]] %s1021_s22  ;;  %s1023_s23 = smov (!%p31_p0, %s33_s23), %s736_s18 }
  0x13   : > { %s38_s25 = ssub.s32 %s732_s17, %s1021_s22  ;;  %p827_p3 = por %p50_p2, %p49_p1 }
  0x14   : > { %p35_p4 = scmp.ge.s32.totalorder %s1023_s23, 2  ;;  %p55_p5 = scmp.ne.s32.totalorder %s716_s13, %s712_s12 }
  0x15   : > { %p56_p6 = scmp.eq.s32.totalorder %s424_s20, 0  ;;  %s96_s27 = sadd.s32 1, %s708_s11 }
  0x16   : > { %s1025_s23 = smov (%p35_p4, %s1023_s23), 0  ;;  %p106_p8 = scmp.ne.s32.totalorder %s708_s11, %s704_s10 }
  0x17   : > { %1002 = sst [smem:[#allocation17_spill]] %s1025_s23  ;;  %p835_p7 = por %p56_p6, %p55_p5 }
  0x18   : > { %s37_s29 = ssub.s32 %s736_s18, %s1025_s23  ;;  %p107_p9 = scmp.eq.s32.totalorder %s424_s20, 3 }
  0x19   : > { %s39_s30 = sor.u32 %s38_s25, %s37_s29  ;;  %p94_p10 = scmp.eq.s32.totalorder %s37_s29, 0 }
  0x1a   : > { %p40_p11 = scmp.eq.s32.totalorder %s39_s30, 0  ;;  %p843_p12 = por %p107_p9, %p106_p8 }
  0x1b   : > { %s848_s4 = scalar_select %p94_p10, %s708_s11, %s96_s27  }
  0x1c   : > { %s851_s5 = scalar_select %p40_p11, %s720_s14, %s42_s24  }
  0x1d   : > { %p112_p13 = scmp.ne.s32.totalorder %s704_s10, %s700_s9  ;;  %p113_p0 = scmp.eq.s32.totalorder %s425_s21, 3 }
  0x1e   : > { %p461_p1 = scmp.lt.s32.totalorder %s740_s19, 4  ;;  %s861_s7 = sand.u32 1, %s720_s14  }
  0x1f   : > { %p856_p2 = por %p113_p0, %p112_p13  ;;  %s428_s8 = sshll.u32 %s861_s7, 2 }
  0x20   : > { %s429_s12 = sshll.u32 %s736_s18, 1  ;;  %s137_s25 = scalar_lea.vmem [#allocation6], %s428_s8 }
  0x21   : > { %s142_s20 = sadd.s32 %s732_s17, %s429_s12  ;;  %s146_s24 = sshll.u32 %s137_s25, 4  ;;  %s147_s24 = int_to_ptr.vmem [resolvable:$true] %s146_s24 }
  0x22   : > { %s430_s27 = sshll.u32 %s142_s20, 6  ;;  %s1006_s0 = sld [smem:[#allocation18_spill]] }
  0x23   : > { %p873_p4 = pnand %p461_p1, %p827_p3  ;;  %p434_p5 = scmp.ge.s32.totalorder %s740_s19, 1 }
  0x24   : > { %p171_p6 = scmp.lt.s32.totalorder %s740_s19, 5  ;;  %s134_s22 = scalar_lea.sflag [#allocation7], %s861_s7 }
  0x25   : > { %p562_p8 = pneg %p873_p4  ;;  %s573_s12 = scalar_lea.vmem %s147_s24, 64 }
  0x26   : > { %p574_p9 = scmp.ne.s32.totalorder %s147_s24, %s573_s12  ;;  %s742_s20 = smov [#allocation6]  }
  0x27   : > { %s578_s25 = sshll.u32 %s742_s20, 4  ;;  %s579_s25 = int_to_ptr.vmem [resolvable:$false] %s578_s25 }
  0x28   : > { %s144_s30 = scalar_lea.hbm %s1006_s0, %s430_s27  ;;  %p576_p10 = pnand %p574_p9, %p562_p8 }
  0x29   : > { %s580_s26 = scalar_lea.vmem %s579_s25, 128  ;;  %p581_p3 = scmp.lt.s32.totalorder %s147_s24, %s579_s25 }
  0x2a   : > { %p577_p11 = pneg %p576_p10  ;;  %p582_p13 = scmp.lt.s32.totalorder %s580_s26, %s573_s12 }
  0x2c   : > { %p583_p0 = por %p582_p13, %p581_p3 }
  0x2e   : > { %p584_p1 = pnand %p583_p0, %p577_p11 }
  0x30   : > { %587 = shalt.err (!%p584_p1)
}
  0x31   : > { %453 = dma.hbm_to_vmem [thread:$0]  (!%p873_p4), %s144_s30, 64, %s147_s24, %s134_s22  }
  0x32   : > { %p891_p9 = pnand %p434_p5, %p171_p6  ;;  %s164_s12 = scalar_lea.hbm %s993_s1, %s430_s27 }
  0x33   : > { %s157_s25 = scalar_lea.vmem [#allocation9], %s428_s8  ;;  %s154_s0 = scalar_lea.sflag [#allocation10], %s861_s7 }
  0x34   : > { %s166_s26 = sshll.u32 %s157_s25, 4  ;;  %s743_s22 = smov [#allocation9]   ;;  %s167_s26 = int_to_ptr.vmem [resolvable:$true] %s166_s26 }
  0x35   : > { %s601_s18 = scalar_lea.vmem %s167_s26, 64  ;;  %s606_s24 = sshll.u32 %s743_s22, 4  ;;  %s607_s24 = int_to_ptr.vmem [resolvable:$false] %s606_s24 }
  0x36   : > { %p602_p10 = scmp.ne.s32.totalorder %s167_s26, %s601_s18  ;;  %s608_s30 = scalar_lea.vmem %s607_s24, 128 }
  0x37   : > { %p609_p5 = scmp.lt.s32.totalorder %s167_s26, %s607_s24  ;;  %p610_p6 = scmp.lt.s32.totalorder %s608_s30, %s601_s18 }
  0x38   : > { %p604_p11 = pnand %p602_p10, %p562_p8 }
  0x39   : > { %p611_p13 = por %p610_p6, %p609_p5 }
  0x3a   : > { %p605_p3 = pneg %p604_p11 }
  0x3c   : > { %p612_p0 = pnand %p611_p13, %p605_p3 }
  0x3e   : > { %615 = shalt.err (!%p612_p0)
}
  0x3f   : > { %456 = dma.hbm_to_vmem [thread:$0]  (!%p873_p4), %s164_s12, 64, %s167_s26, %s154_s0  }
  0x40   : > { %175 = sbr.rel (%p891_p9) target bundleno = 558 (0x22e), region = 28  ;;  %s177_s7 = sand.u32 (!%p891_p9), 1, %s716_s13  }
  0x41   : > { %s435_s8 = sshll.u32 (!%p891_p9), %s177_s7, 2  ;;  %s178_s27 = scalar_lea.sflag (!%p891_p9), [#allocation7], %s177_s7 }
  0x42   : > { %s181_s21 = scalar_lea.vmem (!%p891_p9), [#allocation6], %s435_s8 }
  0x45   : > { %687 = dma.done.wait (%p835_p7), %s178_s27, 64  }
  0x46   : > { %689 = vsyncadd (%p835_p7), %s178_s27, 4294967232  ;;  %s187_s18 = scalar_lea.sflag [#allocation10], %s177_s7  ;;  %s190_s20 = scalar_lea.vmem [#allocation9], %s435_s8 }
  0x47   : > { %691 = dma.done.wait (%p835_p7), %s187_s18, 64  }
  0x48   : > { %693 = vsyncadd (%p835_p7), %s187_s18, 4294967232  ;;  %s213_s0 = sand.u32 1, %s704_s10   ;;  %p437_p4 = scmp.ne.s32.totalorder %s724_s15, 0 }
  0x49   : > { %s920_s23 = scalar_lea.vmem [#allocation11], %s213_s0 }
  0x4a   : > { %218 = sbr.rel (%p437_p4) target bundleno = 82 (0x52), region = 40 }
  0x4f   : > { %vm219_vm0 = vcmask 3072   ;;  %v744_v0 = vmov 0.0  }
  0x50   : > { %220 = vst.msk [vmem:[#allocation2] sm:$0xf] %vm219_vm0, %v744_v0  ;;  %221 = vst.msk [vmem:[#allocation3] sm:$0xf] %vm219_vm0, %v744_v0 }
  0x51   : > { %222 = vst.msk [vmem:[#allocation4] sm:$0xf] %vm219_vm0, %v744_v0  ;;  %223 = vst.msk [vmem:[#allocation5] sm:$0xf] %vm219_vm0, %v744_v0 }
  0x52 PF: > { %v225_v1 = vld [vmem:[%s190_s20] sm:$0xf]  ;;  %vm226_vm1 = vcmask 1043456   ;;  %v224_v2 = vld [vmem:[%s181_s21] sm:$0xf]  ;;  %vm253_vm2 = vcmask 3072  }
  0x53   : > { %v263_v3 = vmul.f32 %v225_v1, %v225_v1  ;;  %v227_v4 = vsel %vm226_vm1, %v224_v2, -inf  ;;  %v270_v8 = vsel %vm226_vm1, %v225_v1, 0.0  ;;  %p438_p7 = scmp.ne.s32.totalorder %s724_s15, 1 }
  0x54   : > { %v228_v5 = vrot.slane %v227_v4, 4 }
  0x55   : > { %v264_v6 = vsel %vm226_vm1, %v263_v3, 0.0 }
  0x56   : > { %265 = vadd.xlane.f32.xlu1 %v264_v6  ;;  %v229_v7 = vmax.f32 %v227_v4, %v228_v5 }
  0x57   : > { %v247_v35 = vld [vmem:[#allocation2] sm:$0xf]  ;;  %v255_v38 = vld [vmem:[#allocation3] sm:$0xf] }
  0x58   : > { %v230_v9 = vrot.slane %v229_v7, 2  ;;  %v262_v29 = vld [vmem:[#allocation4] sm:$0xf]  ;;  %v269_v32 = vld [vmem:[#allocation5] sm:$0xf] }
  0x5a   : > { %v231_v10 = vmax.f32 %v229_v7, %v230_v9  ;;  %271 = vadd.xlane.f32.xlu1 %v270_v8 }
  0x5c   : > { %v232_v11 = vrot.slane %v231_v10, 1 }
  0x5e   : > { %v233_v12 = vmax.f32 %v231_v10, %v232_v11 }
  0x60   : > { %v234_v13 = vsub.f32 %v224_v2, %v233_v12 }
  0x62   : > { %v235_v14 = vmul.f32 1.442695, %v234_v13 }
  0x64   : > { %552 = vpow2.f32 %v235_v14 }
  0x71   : > { %v553_v15 = vpop.eup %552 }
  0x72   : > { %v237_v16 = vsel %vm226_vm1, %v553_v15, 0.0 }
  0x73   : > { %v238_v17 = vrot.slane %v237_v16, 4 }
  0x75   : > { %v239_v18 = vadd.f32 %v238_v17, %v237_v16 }
  0x77   : > { %v240_v19 = vrot.slane %v239_v18, 2 }
  0x79   : > { %v241_v20 = vadd.f32 %v240_v19, %v239_v18 }
  0x7b   : > { %v242_v21 = vrot.slane %v241_v20, 1 }
  0x7d   : > { %v243_v22 = vadd.f32 %v242_v21, %v241_v20 }
  0x7f   : > { %554 = vrcp.f32 %v243_v22 }
  0x8c   : > { %v555_v23 = vpop.eup %554 }
  0x8d   : > { %v246_v24 = vmul.f32 %v555_v23, %v553_v15 }
  0x8f   : > { %v248_v25 = vmul.f32 %v246_v24, %v225_v1  ;;  %v256_v26 = vmul.f32 %v246_v24, %v246_v24 }
  0x91   : > { %v249_v27 = vsel %vm226_vm1, %v248_v25, 0.0  ;;  %v257_v28 = vsel %vm226_vm1, %v256_v26, 0.0 }
  0x92   : > { %250 = vadd.xlane.f32.xlu0 %v249_v27 }
  0x96   : > { %258 = vadd.xlane.f32.xlu0 %v257_v28 }
  0xdf   : > { %v266_v30 = vpop.xlane.xlu1 %265 }
  0xe0   : > { %v267_v31 = vadd.f32 %v266_v30, %v262_v29 }
  0xe2   : > { %268 = vst.msk [vmem:[#allocation4] sm:$0xf] %vm253_vm2, %v267_v31 }
  0xe3   : > { %v272_v33 = vpop.xlane.xlu1 %271 }
  0xe4   : > { %v273_v34 = vadd.f32 %v272_v33, %v269_v32 }
  0xe6   : > { %274 = vst.msk [vmem:[#allocation5] sm:$0xf] %vm253_vm2, %v273_v34 }
 0x11b   : > { %v251_v36 = vpop.xlane.xlu0 %250 }
 0x11c   : > { %v252_v37 = vadd.f32 %v251_v36, %v247_v35 }
 0x11e   : > { %254 = vst.msk [vmem:[#allocation2] sm:$0xf] %vm253_vm2, %v252_v37  ;;  %278 = sbr.rel (%p438_p7) target bundleno = 535 (0x217), region = 44 }
 0x11f   : > { %v259_v39 = vpop.xlane.xlu0 %258 }
 0x120   : > { %v260_v40 = vadd.f32 %v259_v39, %v255_v38 }
 0x122   : > { %261 = vst.msk [vmem:[#allocation3] sm:$0xf] %vm253_vm2, %v260_v40 }
 0x123   : > { %v281_v41 = vld [vmem:[#allocation5] sm:$0xf]  ;;  %v282_v45 = vld [vmem:[#allocation4] sm:$0xf] }
 0x124   : > { %v283_v42 = vmul.f32 %v281_v41, %v281_v41 }
 0x125   : > { %v279_v51 = vld [vmem:[#allocation2] sm:$0xf] }
 0x126   : > { %v284_v43 = vadd.f32 1e-07, %v283_v42 }
 0x128   : > { %556 = vrcp.f32 %v284_v43 }
 0x129   : > { %v280_v44 = vld [vmem:[#allocation3] sm:$0xf] }
 0x135   : > { %v557_v46 = vpop.eup %556 }
 0x136   : > { %v289_v47 = vmul.f32 %v557_v46, %v280_v44  ;;  %v290_v48 = vmul.f32 %v557_v46, %v282_v45  ;;  %v287_v52 = vmul.f32 %v557_v46, %v279_v51 }
 0x138   : > { %v291_v49 = vadd.f32 %v290_v48, %v289_v47  ;;  %v288_v53 = vmul.f32 2.0, %v287_v52 }
 0x13a   : > { %v292_v50 = vadd.f32 1e-07, %v291_v49 }
 0x13c   : > { %558 = vrcp.f32 %v292_v50 }
 0x149   : > { %v559_v54 = vpop.eup %558 }
 0x14a   : > { %v294_v55 = vmul.f32 %v559_v54, %v288_v53 }
 0x14c   : > { %v295_v56 = vsel %vm253_vm2, %v294_v55, 0.0 }
 0x14d   : > { %296 = vadd.xlane.f32.xlu0 %v295_v56 }
 0x1d6   : > { %v297_v57 = vpop.xlane.xlu0 %296 }
 0x1d7   : > { %v298_v58 = vrot.slane %v297_v57, 4 }
 0x1d9   : > { %v299_v59 = vadd.f32 %v298_v58, %v297_v57 }
 0x1db   : > { %v300_v60 = vrot.slane %v299_v59, 2 }
 0x1dd   : > { %v301_v61 = vadd.f32 %v300_v60, %v299_v59 }
 0x1df   : > { %v302_v62 = vrot.slane %v301_v61, 1 }
 0x1e1   : > { %v303_v63 = vadd.f32 %v302_v62, %v301_v61 }
 0x1e3   : > { %442 = vpush %v303_v63 }
 0x214   : > { %s443_s15 = spop %442 }
 0x215   : > { %v305_v0 = vstv %s443_s15 }
 0x216   : > { %306 = vst [vmem:[%s920_s23] sm:$0x1] %v305_v0 }
 0x217 PF: > { %s439_s28 = sshll.u32 %s728_s16, 4  ;;  %s320_s26 = sshll.u32 %s920_s23, 4  ;;  %s321_s26 = int_to_ptr.vmem [resolvable:$true] %s320_s26 }
 0x218   : > { %s318_s25 = scalar_lea.hbm %s994_s2, %s439_s28  ;;  %s308_s22 = scalar_lea.sflag [#allocation8], %s213_s0 }
 0x219   : > { %s616_s24 = scalar_lea.vmem %s321_s26, 16  ;;  %s745_s30 = smov [#allocation11]  }
 0x21a   : > { %p617_p8 = scmp.ne.s32.totalorder %s321_s26, %s616_s24  ;;  %s620_s7 = sshll.u32 %s745_s30, 4  ;;  %s621_s7 = int_to_ptr.vmem [resolvable:$false] %s620_s7 }
 0x21b   : > { %s622_s8 = scalar_lea.vmem %s621_s7, 32  ;;  %p623_p10 = scmp.lt.s32.totalorder %s321_s26, %s621_s7 }
 0x21c   : > { %p618_p1 = pnand %p617_p8, %p843_p12  ;;  %p624_p11 = scmp.lt.s32.totalorder %s622_s8, %s616_s24 }
 0x21e   : > { %p619_p9 = pneg %p618_p1  ;;  %p625_p3 = por %p624_p11, %p623_p10 }
 0x220   : > { %p626_p5 = pnand %p625_p3, %p619_p9 }
 0x222   : > { %629 = shalt.err (!%p626_p5)
}
 0x223   : > { %s630_s16 = scalar_lea.hbm %s318_s25, 16  ;;  %s634_s18 = scalar_lea.hbm %s994_s2, 32 }
 0x224   : > { %p631_p6 = scmp.ne.s32.totalorder %s318_s25, %s630_s16  ;;  %p635_p4 = scmp.lt.s32.totalorder %s318_s25, %s994_s2 }
 0x225   : > { %p636_p7 = scmp.lt.s32.totalorder %s634_s18, %s630_s16 }
 0x226   : > { %p632_p13 = pnand %p631_p6, %p843_p12 }
 0x227   : > { %p637_p8 = por %p636_p7, %p635_p4 }
 0x228   : > { %p633_p0 = pneg %p632_p13 }
 0x22a   : > { %p638_p1 = pnand %p637_p8, %p633_p0 }
 0x22c   : > { %641 = shalt.err (!%p638_p1)
}
 0x22d   : > { %448 = dma.vmem_to_hbm [thread:$0]  (%p843_p12), %s321_s26, 16, %s318_s25, %s308_s22  }
 0x22e PF: > { %p462_p9 = scmp.ge.s32.totalorder %s740_s19, 2  ;;  %s332_s23 = sand.u32 1, %s700_s9  }
 0x22f   : > { %s333_s15 = scalar_lea.sflag [#allocation8], %s332_s23 }
 0x230   : > { %p458_p10 = pnand %p462_p9, %p856_p2 }
 0x232   : > { %p459_p11 = pneg %p458_p10 }
 0x234   : > { %695 = dma.done.wait (%p459_p11), %s333_s15, 16  }
 0x235   : > { %697 = vsyncadd (%p459_p11), %s333_s15, 4294967280  ;;  %s21_s19 = sadd.s32 1, %s740_s19   ;;  %s1009_s16 = sld [smem:[#allocation15_spill]] }
 0x236   : > { %p18_p3 = scmp.ge.s32.totalorder %s21_s19, 6   ;;  %s1010_s3 = sld [smem:[#allocation16_spill]] }
 0x237   : > { %s1011_s18 = sld [smem:[#allocation17_spill]]  ;;  %s1012_s9 = smov %s704_s10 }
 0x238   : > { %s1013_s10 = smov %s708_s11  ;;  %s1014_s11 = smov %s848_s4 }
 0x239   : > { %s1015_s12 = smov %s716_s13  ;;  %s1016_s13 = smov %s720_s14 }
 0x23a   : > { %s1017_s14 = smov %s851_s5  ;;  %s1018_s15 = smov %s732_s17 }
 0x23b   :  { %20 = sbr.rel (!%p18_p3) target bundleno = 13 (0xd), region = 94 }
 0x23c   : > { %s1019_s17 = smov %s1010_s3 }
 0x240   :  { %337 = vsyncpa [#allocation7], 1 }
 0x241   :  { %339 = vsyncpa [#allocation7 + $0x1], 1 }
 0x242   :  { %340 = vsyncpa [#allocation10], 1 }
 0x243   :  { %342 = vsyncpa [#allocation10 + $0x1], 1 }
 0x244   :  { %343 = vsyncpa [#allocation8], 1 }
 0x245   :  { %345 = vsyncpa [#allocation8 + $0x1], 1 }

</bundles_post_ra>
